<compile_context>
chip_gen: v6e
topology: v6e:2x2x1
jax: 0.10.0
libtpu: 0.0.40
codegen_flags: <defaults>
</compile_context>

<pallas_src>
import jax
import jax.numpy as jnp
from jax.experimental import pallas as pl
from jax.experimental.pallas import tpu as pltpu


def _block_target_bytes():
    """Per-stream block-byte target, generation aware (v7x: 64 MiB VMEM/TC,
    v5e/v6e: 128 MiB).  1-2 MiB per streamed block is already ~85%+ of the
    measured HBM roofline for streaming kernels."""
    try:
        vmem = pltpu.get_tpu_info().vmem_capacity_bytes
    except Exception:
        vmem = 64 << 20
    return (1 << 20) if vmem < (96 << 20) else (2 << 20)


def _sublane_unit(dtype):
    # Native sublane packing: 8 rows for 32-bit, 16 for 16-bit, 32 for 8-bit.
    return max(8, 32 // jnp.dtype(dtype).itemsize)


def _choose_rows(total_rows, row_bytes, unit, target_bytes):
    """Rows per block: a multiple of `unit` (or the full row count, which is
    always a legal block), sized so one streamed block stays near
    `target_bytes`, and capped so the grid has >= 2 steps whenever possible
    (pipeline overlap; feeds both v7x TensorCores)."""
    if total_rows <= unit:
        return total_rows
    tr = max(unit, (target_bytes // max(row_bytes, 1)) // unit * unit)
    if total_rows >= 2 * unit:
        tr = min(tr, max(unit, (total_rows // 2) // unit * unit))
    return min(tr, total_rows)


def _bigate_flat_kernel(f1_ref, f2_ref, mb_ref, ma_ref, b_ref, o1_ref, o2_ref):
    """Flat lane-dense path for small C (128 % C == 0).

    f*_ref: (TR, 128) in the input dtype (each 128-lane row packs 128//C
    consecutive positions).  mb/ma_ref: (128, 128) block-diagonal segment-sum
    matrices with the gate weight folded in (mb[i, j] = w_b[i % C] iff
    i // C == j // C), so one MXU matmul yields the per-position gate logit
    replicated across that position's C lanes.  b_ref: (2,) f32 in SMEM.
    """
    f1 = f1_ref[...]
    f2 = f2_ref[...]
    fuse = f1 + f2                                   # stays in input dtype
    l1 = jnp.dot(fuse, mb_ref[...], preferred_element_type=jnp.float32,
                 precision=jax.lax.Precision.HIGHEST) + b_ref[0]
    l2 = jnp.dot(fuse, ma_ref[...], preferred_element_type=jnp.float32,
                 precision=jax.lax.Precision.HIGHEST) + b_ref[1]
    s1 = jax.nn.sigmoid(l1)                          # (TR, 128) f32, replicated
    s2 = jax.nn.sigmoid(l2)
    o1_ref[...] = (f1 * s1.astype(f1.dtype)).astype(o1_ref.dtype)
    o2_ref[...] = (f2 * s2.astype(f2.dtype)).astype(o2_ref.dtype)


def _bigate_rows_kernel(f1_ref, f2_ref, w_ref, b_ref, o1_ref, o2_ref):
    """Channels-last path: f*_ref (TR, C); w_ref (2, C) in input dtype;
    b_ref (2,) f32 in SMEM.  Lane-dense when C % 128 == 0; otherwise a correct
    lane-sparse fallback (HBM traffic is still the 2R+2W minimum)."""
    f1 = f1_ref[...]
    f2 = f2_ref[...]
    fuse = f1 + f2                                   # stays in input dtype
    wb = w_ref[0:1, :]                               # (1, C)
    wa = w_ref[1:2, :]
    # VPU multiply + lane reduce, accumulated in f32 -> (TR, 1).
    l1 = jnp.sum(fuse * wb, axis=-1, keepdims=True, dtype=jnp.float32) + b_ref[0]
    l2 = jnp.sum(fuse * wa, axis=-1, keepdims=True, dtype=jnp.float32) + b_ref[1]
    s1 = jax.nn.sigmoid(l1)
    s2 = jax.nn.sigmoid(l2)
    o1_ref[...] = (f1 * s1.astype(f1.dtype)).astype(o1_ref.dtype)
    o2_ref[...] = (f2 * s2.astype(f2.dtype)).astype(o2_ref.dtype)


def bigate1d_2(feat1, feat2, w_b, bias_b, w_a, bias_a, *, donate_inputs=False):
    """BiGate1D_2 forward.  feat1, feat2: (B, L, C); w_b, w_a: (C,); biases ()."""
    B, L, C = feat1.shape
    assert feat2.shape == (B, L, C)
    assert feat1.dtype == feat2.dtype
    dtype = feat1.dtype
    itemsize = jnp.dtype(dtype).itemsize
    unit = _sublane_unit(dtype)
    target = _block_target_bytes()

    biases = jnp.stack([jnp.asarray(bias_b, jnp.float32).reshape(()),
                        jnp.asarray(bias_a, jnp.float32).reshape(())])      # (2,)
    smem_spec = pl.BlockSpec(memory_space=pltpu.MemorySpace.SMEM)
    aliases = {0: 0, 1: 1} if donate_inputs else {}

    use_flat = (C < 128) and (128 % C == 0) and ((B * L * C) % 128 == 0)

    if use_flat:
        # Lane-dense flat view: zero transposes, zero padding, minimal traffic.
        rows = (B * L * C) // 128
        tr = _choose_rows(rows, 128 * itemsize, unit, target)
        grid = (pl.cdiv(rows, tr),)
        block_bytes = tr * 128 * itemsize

        lane = jnp.arange(128)
        same_grp = (lane[:, None] // C) == (lane[None, :] // C)            # (128,128)
        w_rep_b = w_b.astype(jnp.float32)[lane % C][:, None]               # (128,1)
        w_rep_a = w_a.astype(jnp.float32)[lane % C][:, None]
        mb = jnp.where(same_grp, w_rep_b, 0.0).astype(dtype)               # (128,128)
        ma = jnp.where(same_grp, w_rep_a, 0.0).astype(dtype)

        feat_spec = pl.BlockSpec((tr, 128), lambda r: (r, 0))
        mat_spec = pl.BlockSpec((128, 128), lambda r: (0, 0))
        out1, out2 = pl.pallas_call(
            _bigate_flat_kernel,
            out_shape=(jax.ShapeDtypeStruct((rows, 128), dtype),
                       jax.ShapeDtypeStruct((rows, 128), dtype)),
            grid_spec=pltpu.PrefetchScalarGridSpec(
                num_scalar_prefetch=0,
                grid=grid,
                in_specs=[feat_spec, feat_spec, mat_spec, mat_spec, smem_spec],
                out_specs=[feat_spec, feat_spec],
            ),
            compiler_params=pltpu.CompilerParams(
                dimension_semantics=("parallel",),
                vmem_limit_bytes=min(48 << 20, 12 * block_bytes + (8 << 20)),
            ),
            input_output_aliases=aliases,
        )(feat1.reshape(rows, 128), feat2.reshape(rows, 128), mb, ma, biases)
        return out1.reshape(B, L, C), out2.reshape(B, L, C)

    # Generic channels-last path on the free (B*L, C) view.
    # TODO(synk): pad ragged B*L*C up to a 128 multiple (extra copy) if the
    # lane-sparse C < 128 fallback ever shows up hot.
    rows = B * L
    row_bytes = pl.cdiv(C, 128) * 128 * itemsize        # VMEM-resident row size
    tr = _choose_rows(rows, row_bytes, unit, target)
    grid = (pl.cdiv(rows, tr),)
    block_bytes = tr * row_bytes

    w = jnp.stack([w_b, w_a], axis=0).astype(dtype)     # (2, C)
    feat_spec = pl.BlockSpec((tr, C), lambda r: (r, 0))
    w_spec = pl.BlockSpec((2, C), lambda r: (0, 0))
    out1, out2 = pl.pallas_call(
        _bigate_rows_kernel,
        out_shape=(jax.ShapeDtypeStruct((rows, C), dtype),
                   jax.ShapeDtypeStruct((rows, C), dtype)),
        grid_spec=pltpu.PrefetchScalarGridSpec(
            num_scalar_prefetch=0,
            grid=grid,
            in_specs=[feat_spec, feat_spec, w_spec, smem_spec],
            out_specs=[feat_spec, feat_spec],
        ),
        compiler_params=pltpu.CompilerParams(
            dimension_semantics=("parallel",),
            vmem_limit_bytes=min(48 << 20, 12 * block_bytes + (8 << 20)),
        ),
        input_output_aliases=aliases,
    )(feat1.reshape(rows, C), feat2.reshape(rows, C), w, biases)
    return out1.reshape(B, L, C), out2.reshape(B, L, C)


def _reference(feat1, feat2, w_b, bias_b, w_a, bias_a):
    # MXU-free f32 reference (elementwise multiply + reduce).
    fuse = (feat1 + feat2).astype(jnp.float32)
    l1 = jnp.sum(fuse * w_b.astype(jnp.float32), axis=-1, keepdims=True) + bias_b
    l2 = jnp.sum(fuse * w_a.astype(jnp.float32), axis=-1, keepdims=True) + bias_a
    s1 = jax.nn.sigmoid(l1).astype(feat1.dtype)
    s2 = jax.nn.sigmoid(l2).astype(feat2.dtype)
    return feat1 * s1, feat2 * s2


if __name__ == "__main__":
    key = jax.random.PRNGKey(0)

    def _make(B, L, C, dtype=jnp.float32):
        kk = jax.random.split(jax.random.fold_in(key, B * 100000 + L * 100 + C), 6)
        feat1 = jax.random.normal(kk[0], (B, L, C), dtype=dtype)
        feat2 = jax.random.normal(kk[1], (B, L, C), dtype=dtype)
        w_b = jax.random.normal(kk[2], (C,), dtype=jnp.float32) * 0.5
        b_b = jax.random.normal(kk[3], (), dtype=jnp.float32) * 0.1
        w_a = jax.random.normal(kk[4], (C,), dtype=jnp.float32) * 0.5
        b_a = jax.random.normal(kk[5], (), dtype=jnp.float32) * 0.1
        return feat1, feat2, w_b, b_b, w_a, b_a

    # (2, 16, 4)  : primary small-C config -> flat lane-dense MXU segment-sum path
    # (2, 16, 128): lane-dense channels-last path
    # (1, 25, 4)  : ragged B*L*C -> lane-sparse fallback + partial last block
    for (B, L, C) in [(2, 16, 4), (2, 16, 128), (1, 25, 4)]:
        args = _make(B, L, C)
        out1, out2 = bigate1d_2(*args)
        jax.block_until_ready((out1, out2))
        ref1, ref2 = _reference(*args)
        assert out1.shape == (B, L, C) and out2.shape == (B, L, C)
        assert jnp.allclose(out1, ref1, atol=1e-5, rtol=1e-5), ("out1 mismatch", B, L, C)
        assert jnp.allclose(out2, ref2, atol=1e-5, rtol=1e-5), ("out2 mismatch", B, L, C)

    print("KERNEL_OK")
</pallas_src>

<mosaic_0001>
module attributes {stable_mosaic.version = 11 : i64} {
  func.func @_bigate_flat_kernel(%arg0: i32, %arg1: memref<1x128xf32, #tpu.memory_space<vmem>>, %arg2: memref<1x128xf32, #tpu.memory_space<vmem>>, %arg3: memref<128x128xf32, #tpu.memory_space<vmem>>, %arg4: memref<128x128xf32, #tpu.memory_space<vmem>>, %arg5: memref<2xf32, #tpu.memory_space<smem>>, %arg6: memref<1x128xf32, #tpu.memory_space<vmem>>, %arg7: memref<1x128xf32, #tpu.memory_space<vmem>>) attributes {dimension_semantics = [#tpu.dimension_semantics<parallel>], iteration_bounds = array<i64: 1>, scalar_prefetch = 0 : i64, scratch_operands = 0 : i64, tpu.core_type = #tpu.core_type<tc>, window_params = [{transform_indices = @transform_0, window_bounds = array<i64: 1, 128>}, {transform_indices = @transform_1, window_bounds = array<i64: 1, 128>}, {pipeline_mode = #tpu.pipeline_mode<synchronous>, transform_indices = @transform_2, window_bounds = array<i64: 128, 128>}, {pipeline_mode = #tpu.pipeline_mode<synchronous>, transform_indices = @transform_3, window_bounds = array<i64: 128, 128>}, {transform_indices = @transform_4, window_bounds = array<i64: 2>}, {transform_indices = @transform_5, window_bounds = array<i64: 1, 128>}, {transform_indices = @transform_6, window_bounds = array<i64: 1, 128>}]} {
    %c0 = arith.constant 0 : index
    %c0_0 = arith.constant 0 : index
    %0 = vector.load %arg1[%c0, %c0_0] : memref<1x128xf32, #tpu.memory_space<vmem>>, vector<1x128xf32>
    %c0_1 = arith.constant 0 : index
    %c0_2 = arith.constant 0 : index
    %1 = vector.load %arg2[%c0_1, %c0_2] : memref<1x128xf32, #tpu.memory_space<vmem>>, vector<1x128xf32>
    %2 = arith.addf %0, %1 : vector<1x128xf32>
    %c0_3 = arith.constant 0 : index
    %c0_4 = arith.constant 0 : index
    %3 = vector.load %arg3[%c0_3, %c0_4] : memref<128x128xf32, #tpu.memory_space<vmem>>, vector<128x128xf32>
    %cst = arith.constant dense<0.000000e+00> : vector<1x128xf32>
    %4 = tpu.matmul %2, %3, %cst {dimension_numbers = #tpu.dot_dimension_numbers<[1], [0], [0], [1], [0, 0, 1, 1], [], []>, precision = #tpu.contract_precision<fp32>} : vector<1x128xf32>, vector<128x128xf32>, vector<1x128xf32> -> vector<1x128xf32>
    %c0_5 = arith.constant 0 : index
    %5 = memref.load %arg5[%c0_5] : memref<2xf32, #tpu.memory_space<smem>>
    %6 = vector.broadcast %5 : f32 to vector<1x128xf32>
    %7 = arith.addf %4, %6 : vector<1x128xf32>
    %c0_6 = arith.constant 0 : index
    %c0_7 = arith.constant 0 : index
    %8 = vector.load %arg4[%c0_6, %c0_7] : memref<128x128xf32, #tpu.memory_space<vmem>>, vector<128x128xf32>
    %cst_8 = arith.constant dense<0.000000e+00> : vector<1x128xf32>
    %9 = tpu.matmul %2, %8, %cst_8 {dimension_numbers = #tpu.dot_dimension_numbers<[1], [0], [0], [1], [0, 0, 1, 1], [], []>, precision = #tpu.contract_precision<fp32>} : vector<1x128xf32>, vector<128x128xf32>, vector<1x128xf32> -> vector<1x128xf32>
    %c1 = arith.constant 1 : index
    %10 = memref.load %arg5[%c1] : memref<2xf32, #tpu.memory_space<smem>>
    %11 = vector.broadcast %10 : f32 to vector<1x128xf32>
    %12 = arith.addf %9, %11 : vector<1x128xf32>
    %13 = arith.negf %7 : vector<1x128xf32>
    %14 = math.exp %13 : vector<1x128xf32>
    %cst_9 = arith.constant 1.000000e+00 : f32
    %15 = vector.broadcast %cst_9 : f32 to vector<1x128xf32>
    %16 = arith.addf %15, %14 : vector<1x128xf32>
    %17 = arith.divf %15, %16 : vector<1x128xf32>
    %18 = arith.negf %12 : vector<1x128xf32>
    %19 = math.exp %18 : vector<1x128xf32>
    %cst_10 = arith.constant 1.000000e+00 : f32
    %20 = vector.broadcast %cst_10 : f32 to vector<1x128xf32>
    %21 = arith.addf %20, %19 : vector<1x128xf32>
    %22 = arith.divf %20, %21 : vector<1x128xf32>
    %23 = arith.mulf %0, %17 : vector<1x128xf32>
    %c0_11 = arith.constant 0 : index
    %c0_12 = arith.constant 0 : index
    %24 = vector.load %arg6[%c0_11, %c0_12] : memref<1x128xf32, #tpu.memory_space<vmem>>, vector<1x128xf32>
    tpu.vector_store %arg6[%c0_11, %c0_12], %23 {strides = array<i32>} : memref<1x128xf32, #tpu.memory_space<vmem>>, vector<1x128xf32>,
    %25 = arith.mulf %1, %22 : vector<1x128xf32>
    %c0_13 = arith.constant 0 : index
    %c0_14 = arith.constant 0 : index
    %26 = vector.load %arg7[%c0_13, %c0_14] : memref<1x128xf32, #tpu.memory_space<vmem>>, vector<1x128xf32>
    tpu.vector_store %arg7[%c0_13, %c0_14], %25 {strides = array<i32>} : memref<1x128xf32, #tpu.memory_space<vmem>>, vector<1x128xf32>,
    return
  }
  func.func @transform_0(%arg0: i32) -> (i32, i32) {
    %c0_i32 = arith.constant 0 : i32
    %c0_i32_0 = arith.constant 0 : i32
    return %arg0, %c0_i32 : i32, i32
  }
  func.func @transform_1(%arg0: i32) -> (i32, i32) {
    %c0_i32 = arith.constant 0 : i32
    %c0_i32_0 = arith.constant 0 : i32
    return %arg0, %c0_i32 : i32, i32
  }
  func.func @transform_2(%arg0: i32) -> (i32, i32) {
    %c0_i32 = arith.constant 0 : i32
    %c0_i32_0 = arith.constant 0 : i32
    %c0_i32_1 = arith.constant 0 : i32
    return %c0_i32, %c0_i32_0 : i32, i32
  }
  func.func @transform_3(%arg0: i32) -> (i32, i32) {
    %c0_i32 = arith.constant 0 : i32
    %c0_i32_0 = arith.constant 0 : i32
    %c0_i32_1 = arith.constant 0 : i32
    return %c0_i32, %c0_i32_0 : i32, i32
  }
  func.func @transform_4(%arg0: i32) -> i32 {
    %c0_i32 = arith.constant 0 : i32
    %c0_i32_0 = arith.constant 0 : i32
    return %c0_i32 : i32
  }
  func.func @transform_5(%arg0: i32) -> (i32, i32) {
    %c0_i32 = arith.constant 0 : i32
    %c0_i32_0 = arith.constant 0 : i32
    return %arg0, %c0_i32 : i32, i32
  }
  func.func @transform_6(%arg0: i32) -> (i32, i32) {
    %c0_i32 = arith.constant 0 : i32
    %c0_i32_0 = arith.constant 0 : i32
    return %arg0, %c0_i32 : i32, i32
  }
}

</mosaic_0001>

<bundles_post_ra>
// kernel: tpu_custom_call.1
= control target key start
LH: loop header
LB: loop body
LE: loop exit
PB: predicated region body
PF: predicated region fallthrough
CT: control target
= control target key end

     0   :  { %12 = vsyncpa [#allocation3], 0  ;;  %s3002_s0 = inlined_call_operand.hbm [shape: f32[1,128], index: 0, kind: input, shape index: {}]   ;;  %s3003_s1 = inlined_call_operand.vmem [shape: f32[1,128], index: 1, kind: input, shape index: {}]   ;;  %s3004_s2 = inlined_call_operand.hbm [shape: f32[128,128], index: 2, kind: input, shape index: {}]   ;;  %s3005_s3 = inlined_call_operand.hbm [shape: f32[128,128], index: 3, kind: input, shape index: {}]   ;;  %s3006_s4 = inlined_call_operand.vmem [shape: f32[2], index: 4, kind: input, shape index: {}]   ;;  %s3007_s5 = inlined_call_operand.hbm [shape: f32[1,128], index: 5, kind: output, shape index: {0}]   ;;  %s3008_s6 = inlined_call_operand.hbm [shape: f32[1,128], index: 6, kind: output, shape index: {1}]  }
   0x1   :  { %13 = vsyncpa [#allocation7], 0 }
   0x2   :  { %14 = vsyncpa [#allocation5], 0 }
   0x3   :  { %15 = vsyncpa [#allocation4], 0 }
   0x4   :  { %16 = vsyncpa [#allocation12], 0  ;;  %s2213_s21 = smov [#allocation6]  }
   0x5   :  { %s34_s22 = sshll.u32 %s2213_s21, 4  ;;  %s35_s22 = int_to_ptr.vmem [resolvable:$true] %s34_s22 }
   0x6   :  { %s2099_s23 = scalar_lea.vmem %s35_s22, 2048  ;;  %p2104_p1 = scmp.lt.s32.totalorder %s35_s22, %s35_s22 }
   0x7   :  { %p2100_p0 = scmp.ne.s32.totalorder %s35_s22, %s2099_s23  ;;  %p2105_p2 = scmp.lt.s32.totalorder %s2099_s23, %s2099_s23 }
   0x9   :  { %p2106_p3 = por %p2105_p2, %p2104_p1 }
   0xb   :  { %p2107_p4 = pnand %p2106_p3, %p2100_p0 }
   0xd   :  { %2110 = shalt.err (!%p2107_p4)
}
   0xe   :  { %s2214_s24 = smov 128   ;;  %s2215_s25 = smov 8  }
   0xf   :  { %40 = dma.hbm_to_vmem [thread:$0]  %s3004_s2, 2048, %s35_s22, [#allocation7], %s2214_s24, %s2214_s24, %s2215_s25  }
  0x10   :  { %s2216_s28 = smov [#allocation2]   ;;  %s2217_s30 = smov [#allocation8]  }
  0x11   :  { %s23_s29 = sshll.u32 %s2216_s28, 4  ;;  %s46_s7 = sshll.u32 %s2217_s30, 4  ;;  %s24_s29 = int_to_ptr.vmem [resolvable:$true] %s23_s29  ;;  %s47_s7 = int_to_ptr.vmem [resolvable:$true] %s46_s7 }
  0x12   :  { %s2119_s8 = scalar_lea.vmem %s24_s29, 16  ;;  %s2123_s9 = scalar_lea.vmem %s24_s29, 32 }
  0x13   :  { %p2120_p5 = scmp.ne.s32.totalorder %s24_s29, %s2119_s8  ;;  %p2124_p6 = scmp.lt.s32.totalorder %s24_s29, %s24_s29 }
  0x14   :  { %p2125_p7 = scmp.lt.s32.totalorder %s2123_s9, %s2119_s8 }
  0x16   :  { %p2126_p8 = por %p2125_p7, %p2124_p6 }
  0x18   :  { %p2127_p9 = pnand %p2126_p8, %p2120_p5 }
  0x1a   :  { %2130 = shalt.err (!%p2127_p9)
}
  0x1b   :  { %26 = dma.hbm_to_vmem [thread:$0]  %s3002_s0, 16, %s24_s29, [#allocation3]  }
  0x1c   :  { %s59_s13 = sshll.u32 %s3006_s4, 4  ;;  %s2139_s14 = scalar_lea.vmem %s47_s7, 2048  ;;  %s60_s13 = int_to_ptr.vmem [resolvable:$true] %s59_s13 }
  0x1d   :  { %p2140_p10 = scmp.ne.s32.totalorder %s47_s7, %s2139_s14  ;;  %p2144_p11 = scmp.lt.s32.totalorder %s47_s7, %s47_s7 }
  0x1e   :  { %p2145_p12 = scmp.lt.s32.totalorder %s2139_s14, %s2139_s14 }
  0x20   :  { %p2146_p13 = por %p2145_p12, %p2144_p11 }
  0x22   :  { %p2147_p0 = pnand %p2146_p13, %p2140_p10 }
  0x24   :  { %2150 = shalt.err (!%p2147_p0)
}
  0x25   :  { %52 = dma.hbm_to_vmem [thread:$0]  %s3005_s3, 2048, %s47_s7, [#allocation7], %s2214_s24, %s2214_s24, %s2215_s25  }
  0x26   :  { %s2151_s17 = scalar_lea.vmem %s60_s13, 16  ;;  %p2156_p2 = scmp.lt.s32.totalorder %s60_s13, %s60_s13 }
  0x27   :  { %p2152_p1 = scmp.ne.s32.totalorder %s60_s13, %s2151_s17  ;;  %p2157_p3 = scmp.lt.s32.totalorder %s2151_s17, %s2151_s17 }
  0x29   :  { %p2158_p4 = por %p2157_p3, %p2156_p2 }
  0x2b   :  { %p2159_p5 = pnand %p2158_p4, %p2152_p1 }
  0x2d   :  { %2162 = shalt.err (!%p2159_p5)
}
  0x2e   :  { %s2218_s0 = smov [#allocation9]  }
  0x2f   :  { %62 = dma.vmem_to_smem %s60_s13, 16, %s2218_s0, [#allocation5]  }
  0x30   :  { %2203 = dma.done.wait [#allocation3], 16  }
  0x31   :  { %2204 = vsyncadd [#allocation3], 4294967280 }
  0x32   :  { %2205 = dma.done.wait [#allocation7], 4096  }
  0x33   :  { %2206 = vsyncadd [#allocation7], 4294963200 }
  0x34   :  { %2207 = dma.done.wait [#allocation5], 16  }
  0x35   :  { %2208 = vsyncadd [#allocation5], 4294967280 }
  0x36   :  { %75 = sfence }
  0x37   :  { %v94_v0 = vld [vmem:[#allocation6 + $0x78] sm:$0xff]  ;;  %v93_v1 = vld [vmem:[#allocation6 + $0x70] sm:$0xff]  ;;  %v92_v2 = vld [vmem:[#allocation6 + $0x68] sm:$0xff]  ;;  %v2219_v3 = vmov 0.0   ;;  %vm2220_vm0 = vmmov 0   ;;  %s95_s18 = sld [smem:[#allocation9]] }
  0x38   :  { %1651 = vmatprep.subr.mxu0 %v2219_v3  ;;  %v2271_v4 = vand.u32 4294901760, %v94_v0  ;;  %v2273_v5 = vand.u32 4294901760, %v93_v1  ;;  %v2275_v6 = vand.u32 4294901760, %v92_v2  ;;  %v91_v7 = vld [vmem:[#allocation6 + $0x60] sm:$0xff]  ;;  %1686 = vmatprep.subr.mxu1 %v2219_v3  ;;  %v90_v8 = vld [vmem:[#allocation6 + $0x58] sm:$0xff]  ;;  %v89_v9 = vld [vmem:[#allocation6 + $0x50] sm:$0xff] }
  0x39   :  { %v2278_v10 = vand.u32 4294901760, %v91_v7  ;;  %v2280_v11 = vand.u32 4294901760, %v90_v8  ;;  %v2282_v12 = vand.u32 4294901760, %v89_v9  ;;  %v88_v13 = vld [vmem:[#allocation6 + $0x48] sm:$0xff]  ;;  %v87_v14 = vld [vmem:[#allocation6 + $0x40] sm:$0xff]  ;;  %1683 = vmatprep.mubr.msk.f32.mxu0 %vm2220_vm0, %v2219_v3  ;;  %1718 = vmatprep.mubr.msk.f32.mxu1 %vm2220_vm0, %v2219_v3  ;;  %v86_v19 = vld [vmem:[#allocation6 + $0x38] sm:$0xff] }
  0x3a   :  { %1652 = vmatpush3.msra.mxu0 %v2271_v4  ;;  %v2290_v15 = vsub.f32 %v94_v0, %v2271_v4  ;;  %v2293_v16 = vsub.f32 %v93_v1, %v2273_v5  ;;  %v2295_v17 = vand.u32 4294901760, %v88_v13  ;;  %v2298_v18 = vsub.f32 %v92_v2, %v2275_v6  ;;  %v85_v26 = vld [vmem:[#allocation6 + $0x30] sm:$0xff]  ;;  %v84_v34 = vld [vmem:[#allocation6 + $0x28] sm:$0xff]  ;;  %v83_v41 = vld [vmem:[#allocation6 + $0x20] sm:$0xff]  ;;  %s2221_s19 = smov [#allocation10]  }
  0x3b   :  { %1653 = vmatprep.subr.mxu0 %v2219_v3  ;;  %v2302_v20 = vsub.f32 %v91_v7, %v2278_v10  ;;  %v2305_v21 = vsub.f32 %v90_v8, %v2280_v11  ;;  %v2311_v25 = vand.u32 4294901760, %v87_v14  ;;  %v2315_v28 = vand.u32 4294901760, %v86_v19  ;;  %v76_v48 = vld [vmem:[#allocation2] sm:$0x1]  ;;  %v81_v55 = vld [vmem:[#allocation6 + $0x10] sm:$0xff]  ;;  %v80_v62 = vld [vmem:[#allocation6 + $0x8] sm:$0xff] }
  0x3c   :  { %1654 = vmatpush3.msra.mxu0 %v2273_v5  ;;  %v191_v22 = vand.u32 4294901760, %v2290_v15  ;;  %v198_v23 = vand.u32 4294901760, %v2293_v16  ;;  %v205_v24 = vand.u32 4294901760, %v2298_v18  ;;  %v2319_v30 = vsub.f32 %v89_v9, %v2282_v12  ;;  %v77_v49 = vld [vmem:[%s3003_s1] sm:$0x1]  ;;  %v79_v9 = vld [vmem:[#allocation6] sm:$0xff] }
  0x3d   :  { %1655 = vmatprep.subr.mxu0 %v2219_v3  ;;  %v212_v27 = vand.u32 4294901760, %v2302_v20  ;;  %v219_v29 = vand.u32 4294901760, %v2305_v21  ;;  %v2332_v35 = vsub.f32 %v88_v13, %v2295_v17  ;;  %v2335_v36 = vand.u32 4294901760, %v85_v26  ;;  %v82_v51 = vld [vmem:[#allocation6 + $0x18] sm:$0xff]  ;;  %s1419_s20 = sshll.u32 %s2221_s19, 4  ;;  %s1420_s20 = int_to_ptr.vmem [resolvable:$true] %s1419_s20 }
  0x3e   :  { %1656 = vmatpush3.msra.mxu0 %v2275_v6  ;;  %v192_v31 = vsub.f32 %v2290_v15, %v191_v22  ;;  %v199_v32 = vsub.f32 %v2293_v16, %v198_v23  ;;  %v206_v33 = vsub.f32 %v2298_v18, %v205_v24  ;;  %v226_v40 = vand.u32 4294901760, %v2319_v30  ;;  %s2163_s21 = scalar_lea.vmem %s1420_s20, 16  ;;  %s2167_s22 = scalar_lea.vmem %s1420_s20, 32 }
  0x3f   :  { %1657 = vmatprep.subr.mxu0 %v2219_v3  ;;  %v213_v39 = vsub.f32 %v2302_v20, %v212_v27  ;;  %v2343_v42 = vand.u32 4294901760, %v84_v34  ;;  %v2346_v43 = vsub.f32 %v87_v14, %v2311_v25  ;;  %v220_v45 = vsub.f32 %v2305_v21, %v219_v29  ;;  %p2164_p6 = scmp.ne.s32.totalorder %s1420_s20, %s2163_s21  ;;  %p2168_p7 = scmp.lt.s32.totalorder %s1420_s20, %s1420_s20 }
  0x40   :  { %1658 = vmatpush3.msra.mxu0 %v2278_v10  ;;  %v193_v37 = vand.u32 4294901760, %v192_v31  ;;  %v200_v38 = vand.u32 4294901760, %v199_v32  ;;  %v207_v44 = vand.u32 4294901760, %v206_v33  ;;  %v233_v46 = vand.u32 4294901760, %v2332_v35  ;;  %p2169_p8 = scmp.lt.s32.totalorder %s2167_s22, %s2163_s21 }
  0x41   :  { %1659 = vmatprep.subr.mxu0 %v2219_v3  ;;  %v2354_v47 = vsub.f32 %v86_v19, %v2315_v28  ;;  %v2361_v50 = vand.u32 4294901760, %v83_v41  ;;  %v214_v52 = vand.u32 4294901760, %v213_v39  ;;  %v227_v53 = vsub.f32 %v2319_v30, %v226_v40 }
  0x42   :  { %1660 = vmatpush3.msra.mxu0 %v2280_v11  ;;  %1687 = vmatpush3.msra.mxu1 %v193_v37  ;;  %v240_v54 = vand.u32 4294901760, %v2346_v43  ;;  %v2369_v56 = vsub.f32 %v85_v26, %v2335_v36  ;;  %v78_v58 = vadd.f32 %v77_v49, %v76_v48  ;;  %v221_v59 = vand.u32 4294901760, %v220_v45  ;;  %p2170_p9 = por %p2169_p8, %p2168_p7 }
  0x43   :  { %1661 = vmatprep.subr.mxu0 %v2219_v3  ;;  %1688 = vmatprep.subr.mxu1 %v2219_v3  ;;  %v247_v57 = vand.u32 4294901760, %v2354_v47  ;;  %v234_v60 = vsub.f32 %v2332_v35, %v233_v46  ;;  %v2378_v61 = vand.u32 4294901760, %v82_v51  ;;  %v2381_v63 = vsub.f32 %v84_v34, %v2343_v42 }
  0x44   :  { %1662 = vmatpush3.msra.mxu0 %v2282_v12  ;;  %1689 = vmatpush3.msra.mxu1 %v200_v38  ;;  %v2385_v0 = vand.u32 4294901760, %v81_v55  ;;  %v2387_v1 = vand.u32 4294901760, %v78_v58  ;;  %v228_v2 = vand.u32 4294901760, %v227_v53  ;;  %v241_v7 = vsub.f32 %v2346_v43, %v240_v54  ;;  %p2171_p10 = pnand %p2170_p9, %p2164_p6 }
  0x45   :  { %1663 = vmatprep.subr.mxu0 %v2219_v3  ;;  %1690 = vmatprep.subr.mxu1 %v2219_v3  ;;  %v254_v8 = vand.u32 4294901760, %v2369_v56  ;;  %v2395_v13 = vsub.f32 %v83_v41, %v2361_v50  ;;  %v248_v14 = vsub.f32 %v2354_v47, %v247_v57  ;;  %v2402_v19 = vand.u32 4294901760, %v80_v62 }
  0x46   :  { %1664 = vmatpush3.msra.mxu0 %v2295_v17  ;;  %1691 = vmatpush3.msra.mxu1 %v207_v44  ;;  %v235_v26 = vand.u32 4294901760, %v234_v60  ;;  %v261_v31 = vand.u32 4294901760, %v2381_v63  ;;  %v2407_v32 = vsub.f32 %v78_v58, %v2387_v1  ;;  %v2410_v33 = vsub.f32 %v82_v51, %v2378_v61 }
  0x47   :  { %1665 = vmatprep.subr.mxu0 %v2219_v3  ;;  %1692 = vmatprep.subr.mxu1 %v2219_v3  ;;  %v2414_v34 = vand.u32 4294901760, %v79_v9  ;;  %v242_v37 = vand.u32 4294901760, %v241_v7  ;;  %v255_v38 = vsub.f32 %v2369_v56, %v254_v8  ;;  %v268_v39 = vand.u32 4294901760, %v2395_v13 }
  0x48   :  { %1666 = vmatpush3.msra.mxu0 %v2311_v25  ;;  %1693 = vmatpush3.msra.mxu1 %v214_v52  ;;  %v2422_v41 = vsub.f32 %v81_v55, %v2385_v0  ;;  %v249_v44 = vand.u32 4294901760, %v248_v14  ;;  %v262_v45 = vsub.f32 %v2381_v63, %v261_v31  ;;  %v2431_v48 = vand.u32 4294901760, %v2407_v32 }
  0x49   :  { %1667 = vmatprep.subr.mxu0 %v2219_v3  ;;  %1694 = vmatprep.subr.mxu1 %v2219_v3  ;;  %v275_v49 = vand.u32 4294901760, %v2410_v33  ;;  %v2435_v51 = vsub.f32 %v80_v62, %v2402_v19  ;;  %v256_v52 = vand.u32 4294901760, %v255_v38  ;;  %v269_v53 = vsub.f32 %v2395_v13, %v268_v39 }
  0x4a   :  { %1668 = vmatpush3.msra.mxu0 %v2315_v28  ;;  %1695 = vmatpush3.msra.mxu1 %v221_v59  ;;  %v282_v55 = vand.u32 4294901760, %v2422_v41  ;;  %v2445_v58 = vsub.f32 %v79_v9, %v2414_v34  ;;  %v263_v59 = vand.u32 4294901760, %v262_v45  ;;  %v181_v60 = vsub.f32 %v2407_v32, %v2431_v48 }
  0x4b   :  { %1669 = vmatprep.subr.mxu0 %v2219_v3  ;;  %1696 = vmatprep.subr.mxu1 %v2219_v3  ;;  %v276_v62 = vsub.f32 %v2410_v33, %v275_v49  ;;  %v270_v7 = vand.u32 4294901760, %v269_v53 }
  0x4c   :  { %1670 = vmatpush3.msra.mxu0 %v2335_v36  ;;  %1697 = vmatpush3.msra.mxu1 %v228_v2  ;;  %v289_v2 = vand.u32 4294901760, %v2435_v51  ;;  %v283_v9 = vsub.f32 %v2422_v41, %v282_v55  ;;  %v296_v14 = vand.u32 4294901760, %v2445_v58 }
  0x4d   :  { %1671 = vmatprep.subr.mxu0 %v2219_v3  ;;  %1698 = vmatprep.subr.mxu1 %v2219_v3 }
  0x4e   :  { %1672 = vmatpush3.msra.mxu0 %v2343_v42  ;;  %1699 = vmatpush3.msra.mxu1 %v235_v26  ;;  %v2466_v26 = vand.u32 4294901760, %v181_v60  ;;  %v290_v38 = vsub.f32 %v2435_v51, %v289_v2  ;;  %v297_v45 = vsub.f32 %v2445_v58, %v296_v14 }
  0x4f   :  { %1673 = vmatprep.subr.mxu0 %v2219_v3  ;;  %1700 = vmatprep.subr.mxu1 %v2219_v3 }
  0x50   :  { %1674 = vmatpush3.msra.mxu0 %v2361_v50  ;;  %1701 = vmatpush3.msra.mxu1 %v242_v37  ;;  %v277_v37 = vand.u32 4294901760, %v276_v62  ;;  %v298_v53 = vand.u32 4294901760, %v297_v45 }
  0x51   :  { %1675 = vmatprep.subr.mxu0 %v2219_v3  ;;  %1702 = vmatprep.subr.mxu1 %v2219_v3 }
  0x52   :  { %1676 = vmatpush3.msra.mxu0 %v2378_v61  ;;  %1703 = vmatpush3.msra.mxu1 %v249_v44  ;;  %v284_v44 = vand.u32 4294901760, %v283_v9 }
  0x53   :  { %1677 = vmatprep.subr.mxu0 %v2219_v3  ;;  %1704 = vmatprep.subr.mxu1 %v2219_v3 }
  0x54   :  { %1678 = vmatpush3.msra.mxu0 %v2385_v0  ;;  %1705 = vmatpush3.msra.mxu1 %v256_v52  ;;  %v291_v52 = vand.u32 4294901760, %v290_v38 }
  0x55   :  { %1679 = vmatprep.subr.mxu0 %v2219_v3  ;;  %1706 = vmatprep.subr.mxu1 %v2219_v3 }
  0x56   :  { %1680 = vmatpush3.msra.mxu0 %v2402_v19  ;;  %1707 = vmatpush3.msra.mxu1 %v263_v59 }
  0x57   :  { %1681 = vmatprep.subr.mxu0 %v2219_v3  ;;  %1708 = vmatprep.subr.mxu1 %v2219_v3 }
  0x58   :  { %1682 = vmatpush3.msra.mxu0 %v2414_v34  ;;  %1709 = vmatpush3.msra.mxu1 %v270_v7 }
  0x59   :  { %1710 = vmatprep.subr.mxu1 %v2219_v3  ;;  %1721 = vmatprep.subr.mxu0 %v2219_v3 }
  0x5a   :  { %1684 = vmatmul.mubr.f32.vlgmr.msra.gmra.mxu0 %v2466_v26  ;;  %1711 = vmatpush3.msra.mxu1 %v277_v37 }
  0x5b   :  { %1722 = vmatpush3.msra.mxu0 %v2290_v15  ;;  %1712 = vmatprep.subr.mxu1 %v2219_v3 }
  0x5c   :  { %1723 = vmatprep.subr.mxu0 %v2219_v3  ;;  %1713 = vmatpush3.msra.mxu1 %v284_v44 }
  0x5d   :  { %1724 = vmatpush3.msra.mxu0 %v2293_v16  ;;  %1714 = vmatprep.subr.mxu1 %v2219_v3 }
  0x5e   :  { %1725 = vmatprep.subr.mxu0 %v2219_v3  ;;  %1715 = vmatpush3.msra.mxu1 %v291_v52  ;;  %v740_v52 = vld [vmem:[#allocation8 + $0x10] sm:$0xff] }
  0x5f   :  { %1726 = vmatpush3.msra.mxu0 %v2298_v18  ;;  %1716 = vmatprep.subr.mxu1 %v2219_v3  ;;  %v749_v18 = vld [vmem:[#allocation8 + $0x58] sm:$0xff] }
  0x60   :  { %1727 = vmatprep.subr.mxu0 %v2219_v3  ;;  %1717 = vmatpush3.msra.mxu1 %v298_v53 }
  0x61   :  { %1728 = vmatpush3.msra.mxu0 %v2302_v20  ;;  %1719 = vmatmul.mubr.f32.vlgmr.msra.gmra.mxu1 %v2387_v1 }
  0x62   :  { %1729 = vmatprep.subr.mxu0 %v2219_v3  ;;  %1756 = vmatprep.subr.mxu1 %v2219_v3 }
  0x63   :  { %1730 = vmatpush3.msra.mxu0 %v2305_v21  ;;  %1757 = vmatpush3.msra.mxu1 %v2271_v4  ;;  %v748_v21 = vld [vmem:[#allocation8 + $0x50] sm:$0xff] }
  0x64   :  { %1731 = vmatprep.subr.mxu0 %v2219_v3  ;;  %1758 = vmatprep.subr.mxu1 %v2219_v3 }
  0x65   :  { %1732 = vmatpush3.msra.mxu0 %v2319_v30  ;;  %1759 = vmatpush3.msra.mxu1 %v2273_v5  ;;  %v746_v30 = vld [vmem:[#allocation8 + $0x40] sm:$0xff] }
  0x66   :  { %1733 = vmatprep.subr.mxu0 %v2219_v3  ;;  %1760 = vmatprep.subr.mxu1 %v2219_v3 }
  0x67   :  { %1734 = vmatpush3.msra.mxu0 %v2332_v35  ;;  %1761 = vmatpush3.msra.mxu1 %v2275_v6 }
  0x68   :  { %1735 = vmatprep.subr.mxu0 %v2219_v3  ;;  %1762 = vmatprep.subr.mxu1 %v2219_v3 }
  0x69   :  { %1736 = vmatpush3.msra.mxu0 %v2346_v43  ;;  %1763 = vmatpush3.msra.mxu1 %v2278_v10  ;;  %v745_v43 = vld [vmem:[#allocation8 + $0x38] sm:$0xff] }
  0x6a   :  { %1737 = vmatprep.subr.mxu0 %v2219_v3  ;;  %1764 = vmatprep.subr.mxu1 %v2219_v3 }
  0x6b   :  { %1738 = vmatpush3.msra.mxu0 %v2354_v47  ;;  %1765 = vmatpush3.msra.mxu1 %v2280_v11 }
  0x6c   :  { %1739 = vmatprep.subr.mxu0 %v2219_v3  ;;  %1766 = vmatprep.subr.mxu1 %v2219_v3 }
  0x6d   :  { %1740 = vmatpush3.msra.mxu0 %v2369_v56  ;;  %1767 = vmatpush3.msra.mxu1 %v2282_v12  ;;  %v2684_v56 = vand.u32 4294901760, %v745_v43 }
  0x6e   :  { %1741 = vmatprep.subr.mxu0 %v2219_v3  ;;  %1768 = vmatprep.subr.mxu1 %v2219_v3 }
  0x6f   :  { %1742 = vmatpush3.msra.mxu0 %v2381_v63  ;;  %1769 = vmatpush3.msra.mxu1 %v2295_v17 }
  0x70   :  { %1743 = vmatprep.subr.mxu0 %v2219_v3  ;;  %1770 = vmatprep.subr.mxu1 %v2219_v3 }
  0x71   :  { %1744 = vmatpush3.msra.mxu0 %v2395_v13  ;;  %1771 = vmatpush3.msra.mxu1 %v2311_v25 }
  0x72   :  { %1745 = vmatprep.subr.mxu0 %v2219_v3  ;;  %1772 = vmatprep.subr.mxu1 %v2219_v3 }
  0x73   :  { %1746 = vmatpush3.msra.mxu0 %v2410_v33  ;;  %1773 = vmatpush3.msra.mxu1 %v2315_v28 }
  0x74   :  { %1747 = vmatprep.subr.mxu0 %v2219_v3  ;;  %1774 = vmatprep.subr.mxu1 %v2219_v3 }
  0x75   :  { %1748 = vmatpush3.msra.mxu0 %v2422_v41  ;;  %1775 = vmatpush3.msra.mxu1 %v2335_v36  ;;  %v2712_v41 = vsub.f32 %v745_v43, %v2684_v56  ;;  %v738_v43 = vld [vmem:[#allocation8] sm:$0xff] }
  0x76   :  { %1749 = vmatprep.subr.mxu0 %v2219_v3  ;;  %1776 = vmatprep.subr.mxu1 %v2219_v3 }
  0x77   :  { %1750 = vmatpush3.msra.mxu0 %v2435_v51  ;;  %1777 = vmatpush3.msra.mxu1 %v2343_v42  ;;  %v906_v45 = vand.u32 4294901760, %v2712_v41 }
  0x78   :  { %1751 = vmatprep.subr.mxu0 %v2219_v3  ;;  %1778 = vmatprep.subr.mxu1 %v2219_v3 }
  0x79   :  { %1752 = vmatpush3.msra.mxu0 %v2445_v58  ;;  %1753 = vmatprep.mubr.msk.f32.mxu0 %vm2220_vm0, %v2219_v3 }
  0x7a   :  { %1779 = vmatpush3.msra.mxu1 %v2361_v50  ;;  %1754 = vmatmul.mubr.f32.vlgmr.msra.gmra.mxu0 %v2407_v32 }
  0x7b   :  { %1780 = vmatprep.subr.mxu1 %v2219_v3  ;;  %1791 = vmatprep.subr.mxu0 %v2219_v3 }
  0x7c   :  { %1781 = vmatpush3.msra.mxu1 %v2378_v61  ;;  %1792 = vmatpush3.msra.mxu0 %v191_v22 }
  0x7d   :  { %1782 = vmatprep.subr.mxu1 %v2219_v3  ;;  %1793 = vmatprep.subr.mxu0 %v2219_v3 }
  0x7e   :  { %1783 = vmatpush3.msra.mxu1 %v2385_v0  ;;  %1794 = vmatpush3.msra.mxu0 %v198_v23  ;;  %v2643_v23 = vand.u32 4294901760, %v749_v18 }
  0x7f   :  { %1784 = vmatprep.subr.mxu1 %v2219_v3  ;;  %1795 = vmatprep.subr.mxu0 %v2219_v3 }
  0x80   :  { %1785 = vmatpush3.msra.mxu1 %v2402_v19  ;;  %1796 = vmatpush3.msra.mxu0 %v205_v24  ;;  %v2661_v35 = vsub.f32 %v749_v18, %v2643_v23  ;;  %v739_v18 = vld [vmem:[#allocation8 + $0x8] sm:$0xff] }
  0x81   :  { %1786 = vmatprep.subr.mxu1 %v2219_v3  ;;  %1797 = vmatprep.subr.mxu0 %v2219_v3 }
  0x82   :  { %1787 = vmatpush3.msra.mxu1 %v2414_v34  ;;  %1788 = vmatprep.mubr.msk.f32.mxu1 %vm2220_vm0, %v2219_v3 }
  0x83   :  { %1798 = vmatpush3.msra.mxu0 %v212_v27  ;;  %1789 = vmatmul.mubr.f32.vlgmr.msra.gmra.mxu1 %v2431_v48  ;;  %v747_v27 = vld [vmem:[#allocation8 + $0x48] sm:$0xff] }
  0x84   :  { %1799 = vmatprep.subr.mxu0 %v2219_v3  ;;  %1826 = vmatprep.subr.mxu1 %v2219_v3 }
  0x85   :  { %1800 = vmatpush3.msra.mxu0 %v219_v29  ;;  %1827 = vmatpush3.msra.mxu1 %v2271_v4  ;;  %v753_v4 = vld [vmem:[#allocation8 + $0x78] sm:$0xff] }
  0x86   :  { %1801 = vmatprep.subr.mxu0 %v2219_v3  ;;  %1828 = vmatprep.subr.mxu1 %v2219_v3 }
  0x87   :  { %1802 = vmatpush3.msra.mxu0 %v226_v40  ;;  %1829 = vmatpush3.msra.mxu1 %v2273_v5  ;;  %v752_v5 = vld [vmem:[#allocation8 + $0x70] sm:$0xff]  ;;  %v2666_v40 = vand.u32 4294901760, %v747_v27 }
  0x88   :  { %1803 = vmatprep.subr.mxu0 %v2219_v3  ;;  %1830 = vmatprep.subr.mxu1 %v2219_v3 }
  0x89   :  { %1804 = vmatpush3.msra.mxu0 %v233_v46  ;;  %1831 = vmatpush3.msra.mxu1 %v2275_v6  ;;  %v2605_v6 = vand.u32 4294901760, %v753_v4  ;;  %v2689_v63 = vsub.f32 %v747_v27, %v2666_v40 }
  0x8a   :  { %1805 = vmatprep.subr.mxu0 %v2219_v3  ;;  %1832 = vmatprep.subr.mxu1 %v2219_v3 }
  0x8b   :  { %1806 = vmatpush3.msra.mxu0 %v240_v54  ;;  %1833 = vmatpush3.msra.mxu1 %v2278_v10  ;;  %v751_v10 = vld [vmem:[#allocation8 + $0x68] sm:$0xff]  ;;  %v2620_v15 = vsub.f32 %v753_v4, %v2605_v6  ;;  %v2680_v54 = vand.u32 4294901760, %v746_v30  ;;  %v892_v59 = vand.u32 4294901760, %v2689_v63 }
  0x8c   :  { %1807 = vmatprep.subr.mxu0 %v2219_v3  ;;  %1834 = vmatprep.subr.mxu1 %v2219_v3  ;;  %v2622_v16 = vand.u32 4294901760, %v751_v10 }
  0x8d   :  { %1808 = vmatpush3.msra.mxu0 %v247_v57  ;;  %1835 = vmatpush3.msra.mxu1 %v2280_v11  ;;  %v2612_v11 = vand.u32 4294901760, %v752_v5  ;;  %v850_v24 = vand.u32 4294901760, %v2620_v15  ;;  %v744_v57 = vld [vmem:[#allocation8 + $0x30] sm:$0xff]  ;;  %v2704_v33 = vsub.f32 %v746_v30, %v2680_v54  ;;  %v893_v44 = vsub.f32 %v2689_v63, %v892_v59 }
  0x8e   :  { %1809 = vmatprep.subr.mxu0 %v2219_v3  ;;  %1836 = vmatprep.subr.mxu1 %v2219_v3  ;;  %v2641_v22 = vsub.f32 %v751_v10, %v2622_v16  ;;  %v907_v30 = vsub.f32 %v2712_v41, %v906_v45 }
  0x8f   :  { %1810 = vmatpush3.msra.mxu0 %v254_v8  ;;  %1837 = vmatpush3.msra.mxu1 %v2282_v12  ;;  %v750_v12 = vld [vmem:[#allocation8 + $0x60] sm:$0xff]  ;;  %v2632_v20 = vsub.f32 %v752_v5, %v2612_v11  ;;  %v878_v8 = vand.u32 4294901760, %v2661_v35  ;;  %v899_v9 = vand.u32 4294901760, %v2704_v33  ;;  %v894_v27 = vand.u32 4294901760, %v893_v44 }
  0x90   :  { %1811 = vmatprep.subr.mxu0 %v2219_v3  ;;  %1838 = vmatprep.subr.mxu1 %v2219_v3 }
  0x91   :  { %1812 = vmatpush3.msra.mxu0 %v261_v31  ;;  %1839 = vmatpush3.msra.mxu1 %v2295_v17  ;;  %v2626_v17 = vand.u32 4294901760, %v750_v12  ;;  %v857_v29 = vand.u32 4294901760, %v2632_v20  ;;  %v900_v10 = vsub.f32 %v2704_v33, %v899_v9 }
  0x92   :  { %1813 = vmatprep.subr.mxu0 %v2219_v3  ;;  %1840 = vmatprep.subr.mxu1 %v2219_v3 }
  0x93   :  { %1814 = vmatpush3.msra.mxu0 %v268_v39  ;;  %1841 = vmatpush3.msra.mxu1 %v2311_v25  ;;  %v2649_v25 = vsub.f32 %v750_v12, %v2626_v17  ;;  %v2706_v39 = vand.u32 4294901760, %v744_v57 }
  0x94   :  { %1815 = vmatprep.subr.mxu0 %v2219_v3  ;;  %1842 = vmatprep.subr.mxu1 %v2219_v3 }
  0x95   :  { %1816 = vmatpush3.msra.mxu0 %v275_v49  ;;  %1843 = vmatpush3.msra.mxu1 %v2315_v28  ;;  %v2653_v28 = vand.u32 4294901760, %v748_v21  ;;  %v871_v46 = vand.u32 4294901760, %v2649_v25  ;;  %v742_v49 = vld [vmem:[#allocation8 + $0x20] sm:$0xff]  ;;  %v2725_v62 = vsub.f32 %v744_v57, %v2706_v39  ;;  %v2769_v57 = vand.u32 4294901760, %v739_v18 }
  0x96   :  { %1817 = vmatprep.subr.mxu0 %v2219_v3  ;;  %1844 = vmatprep.subr.mxu1 %v2219_v3  ;;  %v2730_v7 = vand.u32 4294901760, %v742_v49 }
  0x97   :  { %1818 = vmatpush3.msra.mxu0 %v282_v55  ;;  %1845 = vmatpush3.msra.mxu1 %v2335_v36  ;;  %v851_v36 = vsub.f32 %v2620_v15, %v850_v24  ;;  %v2675_v47 = vsub.f32 %v748_v21, %v2653_v28  ;;  %v872_v13 = vsub.f32 %v2649_v25, %v871_v46  ;;  %v913_v12 = vand.u32 4294901760, %v2725_v62 }
  0x98   :  { %1819 = vmatprep.subr.mxu0 %v2219_v3  ;;  %1846 = vmatprep.subr.mxu1 %v2219_v3  ;;  %v879_v55 = vsub.f32 %v2661_v35, %v878_v8  ;;  %v2749_v5 = vsub.f32 %v742_v49, %v2730_v7  ;;  %v2757_v21 = vand.u32 4294901760, %v740_v52  ;;  %v908_v49 = vand.u32 4294901760, %v907_v30 }
  0x99   :  { %1820 = vmatpush3.msra.mxu0 %v289_v2  ;;  %1847 = vmatpush3.msra.mxu1 %v2343_v42  ;;  %v864_v42 = vand.u32 4294901760, %v2641_v22  ;;  %v873_v60 = vand.u32 4294901760, %v872_v13 }
  0x9a   :  { %1821 = vmatprep.subr.mxu0 %v2219_v3  ;;  %1848 = vmatprep.subr.mxu1 %v2219_v3  ;;  %v880_v37 = vand.u32 4294901760, %v879_v55  ;;  %v927_v13 = vand.u32 4294901760, %v2749_v5  ;;  %v2790_v55 = vsub.f32 %v739_v18, %v2769_v57 }
  0x9b   :  { %1822 = vmatpush3.msra.mxu0 %v296_v14  ;;  %1823 = vmatprep.mubr.msk.f32.mxu0 %vm2220_vm0, %v2219_v3  ;;  %v741_v14 = vld [vmem:[#allocation8 + $0x18] sm:$0xff] }
  0x9c   :  { %1849 = vmatpush3.msra.mxu1 %v2361_v50  ;;  %1824 = vmatmul.mubr.f32.vlgmr.msra.gmra.mxu0 %v2387_v1  ;;  %v858_v50 = vsub.f32 %v2632_v20, %v857_v29  ;;  %v2745_v53 = vand.u32 4294901760, %v741_v14 }
  0x9d   :  { %1850 = vmatprep.subr.mxu1 %v2219_v3  ;;  %1861 = vmatprep.subr.mxu0 %v2219_v3 }
  0x9e   :  { %1851 = vmatpush3.msra.mxu1 %v2378_v61  ;;  %1862 = vmatpush3.msra.mxu0 %v2605_v6  ;;  %v852_v61 = vand.u32 4294901760, %v851_v36  ;;  %v859_v31 = vand.u32 4294901760, %v858_v50  ;;  %v2767_v50 = vsub.f32 %v741_v14, %v2745_v53  ;;  %v928_v14 = vsub.f32 %v2749_v5, %v927_v13 }
  0x9f   :  { %1852 = vmatprep.subr.mxu1 %v2219_v3  ;;  %1863 = vmatprep.subr.mxu0 %v2219_v3 }
  0xa0   :  { %1853 = vmatpush3.msra.mxu1 %v2385_v0  ;;  %1864 = vmatpush3.msra.mxu0 %v2612_v11  ;;  %v865_v0 = vsub.f32 %v2641_v22, %v864_v42  ;;  %v929_v18 = vand.u32 4294901760, %v928_v14 }
  0xa1   :  { %1854 = vmatprep.subr.mxu1 %v2219_v3  ;;  %1865 = vmatprep.subr.mxu0 %v2219_v3 }
  0xa2   :  { %1855 = vmatpush3.msra.mxu1 %v2402_v19  ;;  %1866 = vmatpush3.msra.mxu0 %v2622_v16  ;;  %v743_v19 = vld [vmem:[#allocation8 + $0x28] sm:$0xff]  ;;  %v866_v51 = vand.u32 4294901760, %v865_v0  ;;  %v914_v0 = vsub.f32 %v2725_v62, %v913_v12 }
  0xa3   :  { %1856 = vmatprep.subr.mxu1 %v2219_v3  ;;  %1867 = vmatprep.subr.mxu0 %v2219_v3  ;;  %v2718_v58 = vand.u32 4294901760, %v743_v19 }
  0xa4   :  { %1857 = vmatpush3.msra.mxu1 %v2414_v34  ;;  %1858 = vmatprep.mubr.msk.f32.mxu1 %vm2220_vm0, %v2219_v3  ;;  %v885_v34 = vand.u32 4294901760, %v2675_v47 }
  0xa5   :  { %1868 = vmatpush3.msra.mxu0 %v2626_v17  ;;  %1859 = vmatmul.mubr.f32.vlgmr.msra.gmra.mxu1 %v2387_v1  ;;  %v2737_v38 = vsub.f32 %v743_v19, %v2718_v58  ;;  %v2779_v19 = vsub.f32 %v740_v52, %v2757_v21 }
  0xa6   :  { %1869 = vmatprep.subr.mxu0 %v2219_v3  ;;  %1896 = vmatprep.subr.mxu1 %v2219_v3  ;;  %v886_v2 = vsub.f32 %v2675_v47, %v885_v34 }
  0xa7   :  { %1870 = vmatpush3.msra.mxu0 %v2643_v23  ;;  %1897 = vmatpush3.msra.mxu1 %v852_v61  ;;  %v920_v36 = vand.u32 4294901760, %v2737_v38  ;;  %v901_v61 = vand.u32 4294901760, %v900_v10  ;;  %v941_v44 = vand.u32 4294901760, %v2779_v19  ;;  %v948_v10 = vand.u32 4294901760, %v2790_v55 }
  0xa8   :  { %1871 = vmatprep.subr.mxu0 %v2219_v3  ;;  %1898 = vmatprep.subr.mxu1 %v2219_v3  ;;  %v887_v4 = vand.u32 4294901760, %v886_v2  ;;  %v915_v2 = vand.u32 4294901760, %v914_v0 }
  0xa9   :  { %1872 = vmatpush3.msra.mxu0 %v2653_v28  ;;  %1899 = vmatpush3.msra.mxu1 %v859_v31  ;;  %v2781_v31 = vand.u32 4294901760, %v738_v43 }
  0xaa   :  { %1873 = vmatprep.subr.mxu0 %v2219_v3  ;;  %1900 = vmatprep.subr.mxu1 %v2219_v3 }
  0xab   :  { %1874 = vmatpush3.msra.mxu0 %v2666_v40  ;;  %1901 = vmatpush3.msra.mxu1 %v866_v51  ;;  %v921_v51 = vsub.f32 %v2737_v38, %v920_v36 }
  0xac   :  { %1875 = vmatprep.subr.mxu0 %v2219_v3  ;;  %1902 = vmatprep.subr.mxu1 %v2219_v3 }
  0xad   :  { %1876 = vmatpush3.msra.mxu0 %v2680_v54  ;;  %1903 = vmatpush3.msra.mxu1 %v873_v60  ;;  %v934_v60 = vand.u32 4294901760, %v2767_v50  ;;  %v922_v52 = vand.u32 4294901760, %v921_v51 }
  0xae   :  { %1877 = vmatprep.subr.mxu0 %v2219_v3  ;;  %1904 = vmatprep.subr.mxu1 %v2219_v3 }
  0xaf   :  { %1878 = vmatpush3.msra.mxu0 %v2684_v56  ;;  %1905 = vmatpush3.msra.mxu1 %v880_v37  ;;  %v2800_v37 = vsub.f32 %v738_v43, %v2781_v31 }
  0xb0   :  { %1879 = vmatprep.subr.mxu0 %v2219_v3  ;;  %1906 = vmatprep.subr.mxu1 %v2219_v3 }
  0xb1   :  { %1880 = vmatpush3.msra.mxu0 %v2706_v39  ;;  %1907 = vmatpush3.msra.mxu1 %v887_v4  ;;  %v935_v4 = vsub.f32 %v2767_v50, %v934_v60  ;;  %v955_v30 = vand.u32 4294901760, %v2800_v37 }
  0xb2   :  { %1881 = vmatprep.subr.mxu0 %v2219_v3  ;;  %1908 = vmatprep.subr.mxu1 %v2219_v3 }
  0xb3   :  { %1882 = vmatpush3.msra.mxu0 %v2718_v58  ;;  %1909 = vmatpush3.msra.mxu1 %v894_v27  ;;  %v942_v27 = vsub.f32 %v2779_v19, %v941_v44  ;;  %v936_v43 = vand.u32 4294901760, %v935_v4 }
  0xb4   :  { %1883 = vmatprep.subr.mxu0 %v2219_v3  ;;  %1910 = vmatprep.subr.mxu1 %v2219_v3 }
  0xb5   :  { %1884 = vmatpush3.msra.mxu0 %v2730_v7  ;;  %1911 = vmatpush3.msra.mxu1 %v901_v61  ;;  %v949_v61 = vsub.f32 %v2790_v55, %v948_v10  ;;  %v943_v0 = vand.u32 4294901760, %v942_v27 }
  0xb6   :  { %1885 = vmatprep.subr.mxu0 %v2219_v3  ;;  %1912 = vmatprep.subr.mxu1 %v2219_v3 }
  0xb7   :  { %1886 = vmatpush3.msra.mxu0 %v2745_v53  ;;  %1913 = vmatpush3.msra.mxu1 %v908_v49  ;;  %v956_v49 = vsub.f32 %v2800_v37, %v955_v30  ;;  %v950_v51 = vand.u32 4294901760, %v949_v61 }
  0xb8   :  { %1887 = vmatprep.subr.mxu0 %v2219_v3  ;;  %1914 = vmatprep.subr.mxu1 %v2219_v3 }
  0xb9   :  { %1888 = vmatpush3.msra.mxu0 %v2757_v21  ;;  %1915 = vmatpush3.msra.mxu1 %v915_v2  ;;  %v957_v2 = vand.u32 4294901760, %v956_v49 }
  0xba   :  { %1889 = vmatprep.subr.mxu0 %v2219_v3  ;;  %1916 = vmatprep.subr.mxu1 %v2219_v3 }
  0xbb   :  { %1890 = vmatpush3.msra.mxu0 %v2769_v57  ;;  %1917 = vmatpush3.msra.mxu1 %v922_v52 }
  0xbc   :  { %1891 = vmatprep.subr.mxu0 %v2219_v3  ;;  %1918 = vmatprep.subr.mxu1 %v2219_v3 }
  0xbd   :  { %1892 = vmatpush3.msra.mxu0 %v2781_v31  ;;  %1919 = vmatpush3.msra.mxu1 %v929_v18 }
  0xbe   :  { %1893 = vmatprep.mubr.msk.f32.mxu0 %vm2220_vm0, %v2219_v3  ;;  %1920 = vmatprep.subr.mxu1 %v2219_v3 }
  0xbf   :  { %1931 = vmatprep.subr.mxu0 %v2219_v3  ;;  %1894 = vmatmul.mubr.f32.vlgmr.msra.gmra.mxu0 %v2466_v26 }
  0xc0   :  { %1921 = vmatpush3.msra.mxu1 %v936_v43  ;;  %1932 = vmatpush3.msra.mxu0 %v2620_v15 }
  0xc1   :  { %1922 = vmatprep.subr.mxu1 %v2219_v3  ;;  %1933 = vmatprep.subr.mxu0 %v2219_v3 }
  0xc2   :  { %1923 = vmatpush3.msra.mxu1 %v943_v0  ;;  %1934 = vmatpush3.msra.mxu0 %v2632_v20  ;;  %v96_v20 = vstv %s95_s18 }
  0xc3   :  { %1924 = vmatprep.subr.mxu1 %v2219_v3  ;;  %1935 = vmatprep.subr.mxu0 %v2219_v3 }
  0xc4   :  { %1925 = vmatpush3.msra.mxu1 %v950_v51  ;;  %1936 = vmatpush3.msra.mxu0 %v2641_v22 }
  0xc5   :  { %1926 = vmatprep.subr.mxu1 %v2219_v3  ;;  %1937 = vmatprep.subr.mxu0 %v2219_v3 }
  0xc6   :  { %1927 = vmatpush3.msra.mxu1 %v957_v2  ;;  %1928 = vmatprep.mubr.msk.f32.mxu1 %vm2220_vm0, %v2219_v3 }
  0xc7   :  { %1938 = vmatpush3.msra.mxu0 %v2649_v25  ;;  %1929 = vmatmul.mubr.f32.vlgmr.msra.gmra.mxu1 %v2387_v1 }
  0xc8   :  { %1939 = vmatprep.subr.mxu0 %v2219_v3  ;;  %1966 = vmatprep.subr.mxu1 %v2219_v3 }
  0xc9   :  { %1940 = vmatpush3.msra.mxu0 %v2661_v35  ;;  %1967 = vmatpush3.msra.mxu1 %v2605_v6 }
  0xca   :  { %1941 = vmatprep.subr.mxu0 %v2219_v3  ;;  %1968 = vmatprep.subr.mxu1 %v2219_v3 }
  0xcb   :  { %1942 = vmatpush3.msra.mxu0 %v2675_v47  ;;  %1969 = vmatpush3.msra.mxu1 %v2612_v11 }
  0xcc   :  { %1943 = vmatprep.subr.mxu0 %v2219_v3  ;;  %1970 = vmatprep.subr.mxu1 %v2219_v3 }
  0xcd   :  { %1944 = vmatpush3.msra.mxu0 %v2689_v63  ;;  %1971 = vmatpush3.msra.mxu1 %v2622_v16 }
  0xce   :  { %1945 = vmatprep.subr.mxu0 %v2219_v3  ;;  %1972 = vmatprep.subr.mxu1 %v2219_v3 }
  0xcf   :  { %1946 = vmatpush3.msra.mxu0 %v2704_v33  ;;  %1973 = vmatpush3.msra.mxu1 %v2626_v17  ;;  %v2089_v33 = vld [vmem:[#allocation2] sm:$0x1] }
  0xd0   :  { %1947 = vmatprep.subr.mxu0 %v2219_v3  ;;  %1974 = vmatprep.subr.mxu1 %v2219_v3 }
  0xd1   :  { %1948 = vmatpush3.msra.mxu0 %v2712_v41  ;;  %1975 = vmatpush3.msra.mxu1 %v2643_v23 }
  0xd2   :  { %1949 = vmatprep.subr.mxu0 %v2219_v3  ;;  %1976 = vmatprep.subr.mxu1 %v2219_v3 }
  0xd3   :  { %1950 = vmatpush3.msra.mxu0 %v2725_v62  ;;  %1977 = vmatpush3.msra.mxu1 %v2653_v28 }
  0xd4   :  { %1951 = vmatprep.subr.mxu0 %v2219_v3  ;;  %1978 = vmatprep.subr.mxu1 %v2219_v3 }
  0xd5   :  { %1952 = vmatpush3.msra.mxu0 %v2737_v38  ;;  %1979 = vmatpush3.msra.mxu1 %v2666_v40 }
  0xd6   :  { %1953 = vmatprep.subr.mxu0 %v2219_v3  ;;  %1980 = vmatprep.subr.mxu1 %v2219_v3 }
  0xd7   :  { %1954 = vmatpush3.msra.mxu0 %v2749_v5  ;;  %1981 = vmatpush3.msra.mxu1 %v2680_v54 }
  0xd8   :  { %1955 = vmatprep.subr.mxu0 %v2219_v3  ;;  %1982 = vmatprep.subr.mxu1 %v2219_v3 }
  0xd9   :  { %1956 = vmatpush3.msra.mxu0 %v2767_v50  ;;  %1983 = vmatpush3.msra.mxu1 %v2684_v56 }
  0xda   :  { %1957 = vmatprep.subr.mxu0 %v2219_v3  ;;  %1984 = vmatprep.subr.mxu1 %v2219_v3 }
  0xdb   :  { %1958 = vmatpush3.msra.mxu0 %v2779_v19  ;;  %1985 = vmatpush3.msra.mxu1 %v2706_v39 }
  0xdc   :  { %1959 = vmatprep.subr.mxu0 %v2219_v3  ;;  %1986 = vmatprep.subr.mxu1 %v2219_v3 }
  0xdd   :  { %1960 = vmatpush3.msra.mxu0 %v2790_v55  ;;  %1987 = vmatpush3.msra.mxu1 %v2718_v58 }
  0xde   :  { %1961 = vmatprep.subr.mxu0 %v2219_v3  ;;  %1988 = vmatprep.subr.mxu1 %v2219_v3 }
  0xdf   :  { %1962 = vmatpush3.msra.mxu0 %v2800_v37  ;;  %1963 = vmatprep.mubr.msk.f32.mxu0 %vm2220_vm0, %v2219_v3 }
  0xe0   :  { %1989 = vmatpush3.msra.mxu1 %v2730_v7  ;;  %1964 = vmatmul.mubr.f32.vlgmr.msra.gmra.mxu0 %v2407_v32 }
  0xe1   :  { %1990 = vmatprep.subr.mxu1 %v2219_v3  ;;  %2001 = vmatprep.subr.mxu0 %v2219_v3 }
  0xe2   :  { %1991 = vmatpush3.msra.mxu1 %v2745_v53  ;;  %2002 = vmatpush3.msra.mxu0 %v850_v24 }
  0xe3   :  { %1992 = vmatprep.subr.mxu1 %v2219_v3  ;;  %2003 = vmatprep.subr.mxu0 %v2219_v3 }
  0xe4   :  { %1993 = vmatpush3.msra.mxu1 %v2757_v21  ;;  %2004 = vmatpush3.msra.mxu0 %v857_v29 }
  0xe5   :  { %1994 = vmatprep.subr.mxu1 %v2219_v3  ;;  %2005 = vmatprep.subr.mxu0 %v2219_v3 }
  0xe6   :  { %1995 = vmatpush3.msra.mxu1 %v2769_v57  ;;  %2006 = vmatpush3.msra.mxu0 %v864_v42 }
  0xe7   :  { %1996 = vmatprep.subr.mxu1 %v2219_v3  ;;  %2007 = vmatprep.subr.mxu0 %v2219_v3 }
  0xe8   :  { %1997 = vmatpush3.msra.mxu1 %v2781_v31  ;;  %1998 = vmatprep.mubr.msk.f32.mxu1 %vm2220_vm0, %v2219_v3 }
  0xe9   :  { %2008 = vmatpush3.msra.mxu0 %v871_v46  ;;  %1999 = vmatmul.mubr.f32.vlgmr.msra.gmra.mxu1 %v2431_v48 }
  0xea   :  { %2009 = vmatprep.subr.mxu0 %v2219_v3  ;;  %2036 = vmatprep.subr.mxu1 %v2219_v3 }
  0xeb   :  { %2010 = vmatpush3.msra.mxu0 %v878_v8  ;;  %2037 = vmatpush3.msra.mxu1 %v2605_v6 }
  0xec   :  { %2011 = vmatprep.subr.mxu0 %v2219_v3  ;;  %2038 = vmatprep.subr.mxu1 %v2219_v3 }
  0xed   :  { %2012 = vmatpush3.msra.mxu0 %v885_v34  ;;  %2039 = vmatpush3.msra.mxu1 %v2612_v11 }
  0xee   :  { %2013 = vmatprep.subr.mxu0 %v2219_v3  ;;  %2040 = vmatprep.subr.mxu1 %v2219_v3 }
  0xef   :  { %2014 = vmatpush3.msra.mxu0 %v892_v59  ;;  %2041 = vmatpush3.msra.mxu1 %v2622_v16 }
  0xf0   :  { %2015 = vmatprep.subr.mxu0 %v2219_v3  ;;  %2042 = vmatprep.subr.mxu1 %v2219_v3 }
  0xf1   :  { %2016 = vmatpush3.msra.mxu0 %v899_v9  ;;  %2043 = vmatpush3.msra.mxu1 %v2626_v17 }
  0xf2   :  { %2017 = vmatprep.subr.mxu0 %v2219_v3  ;;  %2044 = vmatprep.subr.mxu1 %v2219_v3 }
  0xf3   :  { %2018 = vmatpush3.msra.mxu0 %v906_v45  ;;  %2045 = vmatpush3.msra.mxu1 %v2643_v23 }
  0xf4   :  { %2019 = vmatprep.subr.mxu0 %v2219_v3  ;;  %2046 = vmatprep.subr.mxu1 %v2219_v3 }
  0xf5   :  { %2020 = vmatpush3.msra.mxu0 %v913_v12  ;;  %2047 = vmatpush3.msra.mxu1 %v2653_v28 }
  0xf6   :  { %2021 = vmatprep.subr.mxu0 %v2219_v3  ;;  %2048 = vmatprep.subr.mxu1 %v2219_v3 }
  0xf7   :  { %2022 = vmatpush3.msra.mxu0 %v920_v36  ;;  %2049 = vmatpush3.msra.mxu1 %v2666_v40 }
  0xf8   :  { %2023 = vmatprep.subr.mxu0 %v2219_v3  ;;  %2050 = vmatprep.subr.mxu1 %v2219_v3 }
  0xf9   :  { %2024 = vmatpush3.msra.mxu0 %v927_v13  ;;  %2051 = vmatpush3.msra.mxu1 %v2680_v54 }
  0xfa   :  { %2025 = vmatprep.subr.mxu0 %v2219_v3  ;;  %2052 = vmatprep.subr.mxu1 %v2219_v3 }
  0xfb   :  { %2026 = vmatpush3.msra.mxu0 %v934_v60  ;;  %2053 = vmatpush3.msra.mxu1 %v2684_v56 }
  0xfc   :  { %2027 = vmatprep.subr.mxu0 %v2219_v3  ;;  %2054 = vmatprep.subr.mxu1 %v2219_v3 }
  0xfd   :  { %2028 = vmatpush3.msra.mxu0 %v941_v44  ;;  %2055 = vmatpush3.msra.mxu1 %v2706_v39 }
  0xfe   :  { %2029 = vmatprep.subr.mxu0 %v2219_v3  ;;  %2056 = vmatprep.subr.mxu1 %v2219_v3 }
  0xff   :  { %2030 = vmatpush3.msra.mxu0 %v948_v10  ;;  %2057 = vmatpush3.msra.mxu1 %v2718_v58 }
 0x100   :  { %2031 = vmatprep.subr.mxu0 %v2219_v3  ;;  %2058 = vmatprep.subr.mxu1 %v2219_v3 }
 0x101   :  { %2032 = vmatpush3.msra.mxu0 %v955_v30  ;;  %2033 = vmatprep.mubr.msk.f32.mxu0 %vm2220_vm0, %v2219_v3 }
 0x102   :  { %2059 = vmatpush3.msra.mxu1 %v2730_v7  ;;  %2034 = vmatmul.mubr.f32.vlgmr.msra.gmra.mxu0 %v2387_v1 }
 0x103   :  { %2060 = vmatprep.subr.mxu1 %v2219_v3  ;;  %2068 = vmatprep.mubr.msk.f32.mxu1 %vm2220_vm0, %v2219_v3 }
 0x104   :  { %2061 = vmatpush3.msra.mxu1 %v2745_v53 }
 0x105   :  { %2062 = vmatprep.subr.mxu1 %v2219_v3 }
 0x106   :  { %2063 = vmatpush3.msra.mxu1 %v2757_v21 }
 0x107   :  { %2064 = vmatprep.subr.mxu1 %v2219_v3 }
 0x108   :  { %2065 = vmatpush3.msra.mxu1 %v2769_v57 }
 0x109   :  { %2066 = vmatprep.subr.mxu1 %v2219_v3 }
 0x10a   :  { %2067 = vmatpush3.msra.mxu1 %v2781_v31 }
 0x10b   :  { %2069 = vmatmul.mubr.f32.vlgmr.msra.gmra.mxu1 %v2387_v1 }
 0x11a   :  { %v184_v32 = vpop.f32.mrf.mxu0 }
 0x11b   :  { %v185_v22 = vadd.f32 %v184_v32, %v96_v20 }
 0x11c   :  { %v1685_v48 = vpop.f32.mrf.mxu0 }
 0x121   :  { %v335_v26 = vpop.f32.mrf.mxu1 }
 0x122   :  { %v336_v24 = vadd.f32 %v335_v26, %v185_v22 }
 0x123   :  { %v1720_v6 = vpop.f32.mrf.mxu1 }
 0x13a   :  { %v439_v11 = vpop.f32.mrf.mxu0 }
 0x13b   :  { %v440_v28 = vadd.f32 %v439_v11, %v336_v24 }
 0x13c   :  { %v1755_v15 = vpop.f32.mrf.mxu0 }
 0x143   :  { %v528_v16 = vpop.f32.mrf.mxu1 }
 0x144   :  { %v529_v3 = vadd.f32 %v528_v16, %v440_v28 }
 0x145   :  { %v1790_v17 = vpop.f32.mrf.mxu1 }
 0x15c   :  { %v647_v23 = vpop.f32.mrf.mxu0 }
 0x15d   :  { %v648_v29 = vadd.f32 %v647_v23, %v529_v3 }
 0x15e   :  { %v1825_v25 = vpop.f32.mrf.mxu0 }
 0x165   :  { %v734_v35 = vpop.f32.mrf.mxu1 }
 0x166   :  { %v735_v40 = vadd.f32 %v734_v35, %v648_v29 }
 0x167   :  { %v1860_v1 = vpop.f32.mrf.mxu1 }
 0x168   :  { %v1445_v42 = vmul.f32 -1.442695, %v735_v40 }
 0x16a   :  { %2081 = vpow2.f32 %v1445_v42 }
 0x177   :  { %v2082_v46 = vpop.eup %2081 }
 0x178   :  { %v1400_v47 = vadd.f32 1.0, %v2082_v46 }
 0x17a   :  { %2083 = vrcp.f32 %v1400_v47 }
 0x17f   :  { %v843_v54 = vpop.f32.mrf.mxu0 }
 0x181   :  { %v1895_v56 = vpop.f32.mrf.mxu0 }
 0x187   :  { %v2084_v63 = vpop.eup %2083  ;;  %v994_v8 = vpop.f32.mrf.mxu1 }
 0x188   :  { %v1409_v39 = vmul.f32 %v2089_v33, %v2084_v63 }
 0x189   :  { %v1930_v34 = vpop.f32.mrf.mxu1 }
 0x18a   :  { %1410 = vst [vmem:[#allocation10] sm:$0x1] %v1409_v39 }
 0x18b   :  { %2174 = shalt.err (!%p2171_p10)
}
 0x18c   :  { %1422 = dma.vmem_to_hbm [thread:$0]  %s1420_s20, 16, %s3007_s5, [#allocation4]   ;;  %v2090_v60 = vld [vmem:[%s3003_s1] sm:$0x1] }
 0x18d   :  { %s1444_s25 = sld [smem:[#allocation9 + $0x1]]  ;;  %s2222_s5 = smov [#allocation11]  }
 0x18e   :  { %s1429_s26 = sshll.u32 %s2222_s5, 4  ;;  %s1430_s26 = int_to_ptr.vmem [resolvable:$true] %s1429_s26 }
 0x18f   :  { %s2183_s29 = scalar_lea.vmem %s1430_s26, 16  ;;  %s2187_s30 = scalar_lea.vmem %s1430_s26, 32 }
 0x190   :  { %p2184_p11 = scmp.ne.s32.totalorder %s1430_s26, %s2183_s29  ;;  %p2188_p12 = scmp.lt.s32.totalorder %s1430_s26, %s1430_s26 }
 0x191   :  { %p2189_p13 = scmp.lt.s32.totalorder %s2187_s30, %s2183_s29 }
 0x193   :  { %v755_v7 = vstv %s1444_s25  ;;  %p2190_p0 = por %p2189_p13, %p2188_p12 }
 0x194   :  { %v844_v9 = vadd.f32 %v843_v54, %v755_v7 }
 0x195   :  { %p2191_p1 = pnand %p2190_p0, %p2184_p11 }
 0x196   :  { %v995_v45 = vadd.f32 %v994_v8, %v844_v9 }
 0x1a0   :  { %v1098_v41 = vpop.f32.mrf.mxu0 }
 0x1a1   :  { %v1099_v5 = vadd.f32 %v1098_v41, %v995_v45 }
 0x1a2   :  { %v1965_v58 = vpop.f32.mrf.mxu0 }
 0x1a9   :  { %v1187_v59 = vpop.f32.mrf.mxu1 }
 0x1aa   :  { %v1188_v12 = vadd.f32 %v1187_v59, %v1099_v5 }
 0x1ab   :  { %v2000_v62 = vpop.f32.mrf.mxu1 }
 0x1c2   :  { %v1306_v38 = vpop.f32.mrf.mxu0 }
 0x1c3   :  { %v1307_v21 = vadd.f32 %v1306_v38, %v1188_v12 }
 0x1c4   :  { %v2035_v53 = vpop.f32.mrf.mxu0 }
 0x1cb   :  { %v1393_v36 = vpop.f32.mrf.mxu1 }
 0x1cc   :  { %v1394_v50 = vadd.f32 %v1393_v36, %v1307_v21 }
 0x1cd   :  { %v2070_v57 = vpop.f32.mrf.mxu1 }
 0x1ce   :  { %v1446_v13 = vmul.f32 -1.442695, %v1394_v50 }
 0x1d0   :  { %2085 = vpow2.f32 %v1446_v13 }
 0x1dd   :  { %v2086_v19 = vpop.eup %2085 }
 0x1de   :  { %v1406_v31 = vadd.f32 1.0, %v2086_v19 }
 0x1e0   :  { %2087 = vrcp.f32 %v1406_v31 }
 0x1ed   :  { %v2088_v55 = vpop.eup %2087 }
 0x1ee   :  { %v1411_v14 = vmul.f32 %v2090_v60, %v2088_v55 }
 0x1f0   :  { %1412 = vst [vmem:[#allocation11] sm:$0x1] %v1411_v14 }
 0x1f1   :  { %2194 = shalt.err (!%p2191_p1)
}
 0x1f2   :  { %1432 = dma.vmem_to_hbm [thread:$0]  %s1430_s26, 16, %s3008_s6, [#allocation12]  }
 0x1f3   :  { %2209 = dma.done.wait [#allocation4], 16  }
 0x1f4   :  { %2210 = vsyncadd [#allocation4], 4294967280 }
 0x1f5   :  { %2211 = dma.done.wait [#allocation12], 16  }
 0x1f6   :  { %2212 = vsyncadd [#allocation12], 4294967280 }
 0x1f7   :  { %1439 = vsyncpa [#allocation3], 1 }
 0x1f8   :  { %1440 = vsyncpa [#allocation7], 1 }
 0x1f9   :  { %1441 = vsyncpa [#allocation4], 1 }
 0x1fa   :  { %1442 = vsyncpa [#allocation12], 1 }
 0x1fb   :  { %1443 = vsyncpa [#allocation5], 1 }

</bundles_post_ra>
